<compile_context>
chip_gen: v6e
topology: v6e:2x2x1
jax: 0.10.0
libtpu: 0.0.40
codegen_flags: <defaults>
</compile_context>

<pallas_src>
import jax
import jax.numpy as jnp
from jax.experimental import pallas as pl
from jax.experimental.pallas import tpu as pltpu

D_MODEL = 128
MAX_LEN = 7
# NOTE: vocab_size == len(sub) == 0 in the source script (empty defaultdict);
# a zero-row embedding table is degenerate, so we use a small synthetic vocab.
# TODO(synk): vocab_size is 0 in the source module; using 16 as a synthetic vocab.
VOCAB_SIZE = 16
LN_EPS = 1e-5  # PyTorch nn.LayerNorm default

V_PAD = 128  # token-table rows padded to a full MXU lane width
P_PAD = 128  # positional-table rows padded to a full MXU lane width


def embedding_kernel(ids_ref, pos_ref, table_ref, gamma_ref, beta_ref, out_ref):
    """One grid step processes TILE_N flattened rows.

    ids_ref   : (TILE_N, 1)        int32   token ids, values in [0, V_PAD)
    pos_ref   : (TILE_N, 1)        int32   position ids, values in [V_PAD, V_PAD+P_PAD)
    table_ref : (V_PAD + P_PAD, D) float32 stacked [token | positional] table (resident)
    gamma_ref : (1, D)             float32 LayerNorm weight (resident)
    beta_ref  : (1, D)             float32 LayerNorm bias (resident)
    out_ref   : (TILE_N, D)        float32
    """
    tile_n = out_ref.shape[0]
    k = table_ref.shape[0]

    ids = ids_ref[...]                                   # (TILE_N, 1)
    pos = pos_ref[...]                                   # (TILE_N, 1)

    # --- fused gather + add: each row selects its token row AND its positional
    # row (disjoint index ranges), one lane-dense one-hot matmul (K = 256) does
    # both gathers and the sum in a single MXU pass.
    # (out-of-range / negative token ids silently contribute a zero embedding
    # instead of erroring like nn.Embedding.)
    col = jax.lax.broadcasted_iota(jnp.int32, (tile_n, k), 1)
    onehot = ((ids == col) | (pos == col)).astype(jnp.float32)      # (TILE_N, K)
    emb = jnp.dot(onehot, table_ref[...],
                  preferred_element_type=jnp.float32)               # (TILE_N, D)

    # --- LayerNorm over d_model (cross-lane reduce on the XLU; compute is
    # filler under the HBM-write bound, so keep the numerically nicer 2-pass).
    mean = jnp.mean(emb, axis=-1, keepdims=True)
    centered = emb - mean
    var = jnp.mean(centered * centered, axis=-1, keepdims=True)
    normed = centered * jax.lax.rsqrt(var + LN_EPS)
    out_ref[...] = normed * gamma_ref[...] + beta_ref[...]


def _choose_tiling(n_rows, rows_per_block_target):
    """Pick (tile_n, n_pad): tile_n % 8 == 0, n_pad % tile_n == 0, n_pad >= n_rows.

    Prefers (a) big blocks (amortize per-step overhead), (b) n_pad == rounded
    n_rows so the trailing output slice is cheap/absent, and (c) >= 2 grid
    blocks whenever there is enough work (v7x has 2 TensorCores).
    """
    n8 = -(-n_rows // 8) * 8                           # rows rounded up to sublanes
    target = max(8, (rows_per_block_target // 8) * 8)

    if n8 <= target:
        # Small / medium: split into two blocks so both v7x cores get work.
        if n8 > 8:
            tile = -(-(n8 // 2) // 8) * 8
            return tile, 2 * tile
        return n8, n8

    # Large: prefer the largest multiple-of-8 tile that divides n8 exactly
    # (no trailing-slice copy).  Divisors of n8 that are multiples of 8 are
    # 8 * divisors of (n8 // 8).
    m = n8 // 8
    best = 8
    q = 1
    while q * q <= m:
        if m % q == 0:
            for d in (q, m // q):
                cand = 8 * d
                if best < cand <= target:
                    best = cand
        q += 1
    if best * 4 >= target:
        return best, n8                                # close enough to target, no extra pad
    # No good divisor: pad up to a multiple of the target tile (one trailing
    # slice copy, still >= 2 grid blocks since n8 > target).
    tile = target
    return tile, -(-n_rows // tile) * tile


def embedding_forward(x, tok_table, pos_table, gamma, beta,
                      *, rows_per_block_target=4096):
    """x: (batch, seq) int32 token ids. Returns (batch, seq, d_model) float32."""
    B, S = x.shape
    V, D = tok_table.shape
    assert S <= pos_table.shape[0], "seq_len must be <= max_len"
    assert D == D_MODEL
    assert V <= V_PAD and pos_table.shape[0] <= P_PAD

    N = B * S
    tile_n, n_pad = _choose_tiling(N, rows_per_block_target)
    grid = (n_pad // tile_n,)

    # Stacked [token | positional] gather table, resident in VMEM (128 KiB).
    table = jnp.zeros((V_PAD + P_PAD, D), jnp.float32)
    table = table.at[:V, :].set(tok_table.astype(jnp.float32))
    table = table.at[V_PAD:V_PAD + pos_table.shape[0], :].set(
        pos_table.astype(jnp.float32))

    ids_flat = x.astype(jnp.int32).reshape(N, 1)
    if n_pad > N:
        ids_flat = jnp.pad(ids_flat, ((0, n_pad - N), (0, 0)))  # pad rows -> token 0
    # Flattened row r = b*S + s  ->  position s = r % S  (offset into pos half).
    pos_flat = (V_PAD + (jnp.arange(n_pad, dtype=jnp.int32) % S)).reshape(n_pad, 1)

    gamma2 = gamma.astype(jnp.float32).reshape(1, D)
    beta2 = beta.astype(jnp.float32).reshape(1, D)

    out_flat = pl.pallas_call(
        embedding_kernel,
        out_shape=jax.ShapeDtypeStruct((n_pad, D), jnp.float32),
        grid_spec=pltpu.PrefetchScalarGridSpec(
            num_scalar_prefetch=0,
            grid=grid,
            in_specs=[
                pl.BlockSpec((tile_n, 1), lambda i: (i, 0)),          # token ids
                pl.BlockSpec((tile_n, 1), lambda i: (i, 0)),          # position ids
                pl.BlockSpec((V_PAD + P_PAD, D), lambda i: (0, 0)),   # table (resident)
                pl.BlockSpec((1, D), lambda i: (0, 0)),               # gamma (resident)
                pl.BlockSpec((1, D), lambda i: (0, 0)),               # beta (resident)
            ],
            out_specs=pl.BlockSpec((tile_n, D), lambda i: (i, 0)),
        ),
        compiler_params=pltpu.CompilerParams(
            dimension_semantics=("parallel",),      # shard row blocks across TCs
            vmem_limit_bytes=32 * 1024 * 1024,      # fits v5e default-; safe on v7x 64 MiB
        ),
    )(ids_flat, pos_flat, table, gamma2, beta2)

    if n_pad > N:
        out_flat = out_flat[:N]
    # TODO(synk): downstream consumers that accept bf16 could take a bf16 store
    # in-kernel to halve the dominant output-write traffic.
    return out_flat.reshape(B, S, D)


def reference_forward(x, tok_table, pos_table, gamma, beta):
    """Pure-JAX reference mirroring the PyTorch forward."""
    tok = tok_table[x]                                   # (B, S, D)
    pos = pos_table[jnp.arange(x.shape[1])][None]        # (1, S, D)
    emb = tok + pos
    mean = jnp.mean(emb, axis=-1, keepdims=True)
    var = jnp.mean((emb - mean) ** 2, axis=-1, keepdims=True)
    return (emb - mean) * jax.lax.rsqrt(var + LN_EPS) * gamma + beta


if __name__ == "__main__":
    key = jax.random.PRNGKey(0)
    k_tok, k_pos, k_x = jax.random.split(key, 3)

    # nn.Embedding ~ N(0,1); LayerNorm gamma=1, beta=0.
    tok_table = jax.random.normal(k_tok, (VOCAB_SIZE, D_MODEL), dtype=jnp.float32)
    pos_table = jax.random.normal(k_pos, (MAX_LEN, D_MODEL), dtype=jnp.float32)
    gamma = jnp.ones((D_MODEL,), dtype=jnp.float32)
    beta = jnp.zeros((D_MODEL,), dtype=jnp.float32)

    # Small example input: batch=2, seq=7 (== max_len), token ids in [0, vocab).
    batch, seq = 2, 7
    x = jax.random.randint(k_x, (batch, seq), 0, VOCAB_SIZE, dtype=jnp.int32)

    out = embedding_forward(x, tok_table, pos_table, gamma, beta)
    out = jax.block_until_ready(out)

    ref = reference_forward(x, tok_table, pos_table, gamma, beta)
    assert out.shape == (batch, seq, D_MODEL)
    assert jnp.allclose(out, ref, atol=1e-4, rtol=1e-4), "mismatch vs reference"

    print("KERNEL_OK")
</pallas_src>

<mosaic_0001>
module attributes {stable_mosaic.version = 11 : i64} {
  func.func @embedding_kernel(%arg0: i32, %arg1: memref<8x1xi32, #tpu.memory_space<vmem>>, %arg2: memref<8x1xi32, #tpu.memory_space<vmem>>, %arg3: memref<256x128xf32, #tpu.memory_space<vmem>>, %arg4: memref<1x128xf32, #tpu.memory_space<vmem>>, %arg5: memref<1x128xf32, #tpu.memory_space<vmem>>, %arg6: memref<8x128xf32, #tpu.memory_space<vmem>>) attributes {dimension_semantics = [#tpu.dimension_semantics<parallel>], iteration_bounds = array<i64: 2>, scalar_prefetch = 0 : i64, scratch_operands = 0 : i64, tpu.core_type = #tpu.core_type<tc>, window_params = [{transform_indices = @transform_0, window_bounds = array<i64: 8, 1>}, {transform_indices = @transform_1, window_bounds = array<i64: 8, 1>}, {pipeline_mode = #tpu.pipeline_mode<synchronous>, transform_indices = @transform_2, window_bounds = array<i64: 256, 128>}, {pipeline_mode = #tpu.pipeline_mode<synchronous>, transform_indices = @transform_3, window_bounds = array<i64: 1, 128>}, {pipeline_mode = #tpu.pipeline_mode<synchronous>, transform_indices = @transform_4, window_bounds = array<i64: 1, 128>}, {transform_indices = @transform_5, window_bounds = array<i64: 8, 128>}]} {
    %c0 = arith.constant 0 : index
    %c0_0 = arith.constant 0 : index
    %0 = vector.load %arg1[%c0, %c0_0] : memref<8x1xi32, #tpu.memory_space<vmem>>, vector<8x1xi32>
    %c0_1 = arith.constant 0 : index
    %c0_2 = arith.constant 0 : index
    %1 = vector.load %arg2[%c0_1, %c0_2] : memref<8x1xi32, #tpu.memory_space<vmem>>, vector<8x1xi32>
    %2 = tpu.iota {dimensions = array<i32: 1>} : vector<8x256xi32>
    %3 = vector.broadcast %0 : vector<8x1xi32> to vector<8x256xi32>
    %4 = arith.cmpi eq, %3, %2 : vector<8x256xi32>
    %5 = vector.broadcast %1 : vector<8x1xi32> to vector<8x256xi32>
    %6 = arith.cmpi eq, %5, %2 : vector<8x256xi32>
    %7 = arith.ori %4, %6 : vector<8x256xi1>
    %8 = arith.extui %7 : vector<8x256xi1> to vector<8x256xi32>
    %9 = arith.sitofp %8 : vector<8x256xi32> to vector<8x256xf32>
    %c0_3 = arith.constant 0 : index
    %c0_4 = arith.constant 0 : index
    %10 = vector.load %arg3[%c0_3, %c0_4] : memref<256x128xf32, #tpu.memory_space<vmem>>, vector<256x128xf32>
    %cst = arith.constant dense<0.000000e+00> : vector<8x128xf32>
    %11 = tpu.matmul %9, %10, %cst {dimension_numbers = #tpu.dot_dimension_numbers<[1], [0], [0], [1], [0, 0, 1, 1], [], []>} : vector<8x256xf32>, vector<256x128xf32>, vector<8x128xf32> -> vector<8x128xf32>
    %cst_5 = arith.constant dense<0.000000e+00> : vector<8xf32>
    %12 = vector.multi_reduction <add>, %11, %cst_5 [1] : vector<8x128xf32> to vector<8xf32>
    %13 = vector.shape_cast %12 : vector<8xf32> to vector<8x1xf32>
    %cst_6 = arith.constant 1.280000e+02 : f32
    %14 = vector.broadcast %cst_6 : f32 to vector<8x1xf32>
    %15 = arith.divf %13, %14 : vector<8x1xf32>
    %16 = vector.broadcast %15 : vector<8x1xf32> to vector<8x128xf32>
    %17 = arith.subf %11, %16 : vector<8x128xf32>
    %18 = arith.mulf %17, %17 : vector<8x128xf32>
    %cst_7 = arith.constant dense<0.000000e+00> : vector<8xf32>
    %19 = vector.multi_reduction <add>, %18, %cst_7 [1] : vector<8x128xf32> to vector<8xf32>
    %20 = vector.shape_cast %19 : vector<8xf32> to vector<8x1xf32>
    %cst_8 = arith.constant 1.280000e+02 : f32
    %21 = vector.broadcast %cst_8 : f32 to vector<8x1xf32>
    %22 = arith.divf %20, %21 : vector<8x1xf32>
    %cst_9 = arith.constant 9.99999974E-6 : f32
    %23 = vector.broadcast %cst_9 : f32 to vector<8x1xf32>
    %24 = arith.addf %22, %23 : vector<8x1xf32>
    %25 = math.rsqrt %24 : vector<8x1xf32>
    %26 = vector.broadcast %25 : vector<8x1xf32> to vector<8x128xf32>
    %27 = arith.mulf %17, %26 : vector<8x128xf32>
    %c0_10 = arith.constant 0 : index
    %c0_11 = arith.constant 0 : index
    %28 = vector.load %arg4[%c0_10, %c0_11] : memref<1x128xf32, #tpu.memory_space<vmem>>, vector<1x128xf32>
    %29 = vector.broadcast %28 : vector<1x128xf32> to vector<8x128xf32>
    %30 = arith.mulf %27, %29 : vector<8x128xf32>
    %c0_12 = arith.constant 0 : index
    %c0_13 = arith.constant 0 : index
    %31 = vector.load %arg5[%c0_12, %c0_13] : memref<1x128xf32, #tpu.memory_space<vmem>>, vector<1x128xf32>
    %32 = vector.broadcast %31 : vector<1x128xf32> to vector<8x128xf32>
    %33 = arith.addf %30, %32 : vector<8x128xf32>
    %c0_14 = arith.constant 0 : index
    %c0_15 = arith.constant 0 : index
    %34 = vector.load %arg6[%c0_14, %c0_15] : memref<8x128xf32, #tpu.memory_space<vmem>>, vector<8x128xf32>
    tpu.vector_store %arg6[%c0_14, %c0_15], %33 {strides = array<i32>} : memref<8x128xf32, #tpu.memory_space<vmem>>, vector<8x128xf32>,
    return
  }
  func.func @transform_0(%arg0: i32) -> (i32, i32) {
    %c0_i32 = arith.constant 0 : i32
    %c0_i32_0 = arith.constant 0 : i32
    return %arg0, %c0_i32 : i32, i32
  }
  func.func @transform_1(%arg0: i32) -> (i32, i32) {
    %c0_i32 = arith.constant 0 : i32
    %c0_i32_0 = arith.constant 0 : i32
    return %arg0, %c0_i32 : i32, i32
  }
  func.func @transform_2(%arg0: i32) -> (i32, i32) {
    %c0_i32 = arith.constant 0 : i32
    %c0_i32_0 = arith.constant 0 : i32
    %c0_i32_1 = arith.constant 0 : i32
    return %c0_i32, %c0_i32_0 : i32, i32
  }
  func.func @transform_3(%arg0: i32) -> (i32, i32) {
    %c0_i32 = arith.constant 0 : i32
    %c0_i32_0 = arith.constant 0 : i32
    %c0_i32_1 = arith.constant 0 : i32
    return %c0_i32, %c0_i32_0 : i32, i32
  }
  func.func @transform_4(%arg0: i32) -> (i32, i32) {
    %c0_i32 = arith.constant 0 : i32
    %c0_i32_0 = arith.constant 0 : i32
    %c0_i32_1 = arith.constant 0 : i32
    return %c0_i32, %c0_i32_0 : i32, i32
  }
  func.func @transform_5(%arg0: i32) -> (i32, i32) {
    %c0_i32 = arith.constant 0 : i32
    %c0_i32_0 = arith.constant 0 : i32
    return %arg0, %c0_i32 : i32, i32
  }
}

</mosaic_0001>

<bundles_post_ra>
// kernel: tpu_custom_call.1
= control target key start
LH: loop header
LB: loop body
LE: loop exit
PB: predicated region body
PF: predicated region fallthrough
CT: control target
= control target key end

     0   :  { %10 = vsyncpa [#allocation3], 0  ;;  %s854_s0 = inlined_call_operand.vmem [shape: s32[16,1], index: 0, kind: input, shape index: {}]   ;;  %s855_s1 = inlined_call_operand.vmem [shape: s32[16,1], index: 1, kind: input, shape index: {}]   ;;  %s856_s2 = inlined_call_operand.hbm [shape: f32[256,128], index: 2, kind: input, shape index: {}]   ;;  %s857_s3 = inlined_call_operand.vmem [shape: f32[1,128], index: 3, kind: input, shape index: {}]   ;;  %s858_s4 = inlined_call_operand.vmem [shape: f32[1,128], index: 4, kind: input, shape index: {}]   ;;  %s859_s5 = inlined_call_operand.hbm [shape: f32[16,128], index: 5, kind: output, shape index: {}]  }
   0x1   :  { %11 = vsyncpa [#allocation4], 0 }
   0x2   :  { %13 = vsyncpa [#allocation4 + $0x1], 0  ;;  %s740_s18 = smov 0   ;;  %s742_s19 = smov 0  }
   0x3   :  { %s744_s20 = smov 0   ;;  %s746_s21 = smov 0  }
   0x4 LB: > { %s761_s22 = sadd.s32 4294967295, %s702_s21   ;;  %s501_s23 = sadd.s32 4294967294, %s702_s21   ;;  %s702_s21 = sphi %s746_s21, %s867_s21   ;;  %s698_s20 = sphi %s744_s20, %s866_s20   ;;  %s694_s19 = sphi %s742_s19, %s865_s19   ;;  %s690_s18 = sphi %s740_s18, %s864_s18  }
   0x5   : > { %s765_s24 = sadd.s32 1, %s702_s21   ;;  %s141_s25 = sadd.s32 1, %s698_s20 }
   0x6   : > { %s138_s26 = ssub.s32 %s702_s21, %s765_s24  ;;  %p151_p0 = scmp.ne.s32.totalorder %s698_s20, %s694_s19 }
   0x7   : > { %p139_p1 = scmp.eq.s32.totalorder %s138_s26, 0  ;;  %p152_p2 = scmp.eq.s32.totalorder %s761_s22, 1 }
   0x8   : > { %p157_p3 = scmp.ne.s32.totalorder %s694_s19, %s690_s18  ;;  %p158_p4 = scmp.eq.s32.totalorder %s501_s23, 1 }
   0x9   : > { %s776_s27 = scalar_select %p139_p1, %s698_s20, %s141_s25  }
   0xa   : > { %p778_p5 = por %p152_p2, %p151_p0  ;;  %p782_p6 = por %p158_p4, %p157_p3 }
   0xb   : > { %p502_p7 = scmp.ge.s32.totalorder %s702_s21, 1  ;;  %p165_p8 = scmp.lt.s32.totalorder %s702_s21, 3 }
   0xc   : > { %s861_s29 = scalar_select %p782_p6, 1, 0 }
   0xd   : > { %p569_p9 = scmp.eq.s32.totalorder %s761_s22, 0  ;;  %p789_p10 = pnand %p502_p7, %p165_p8 }
   0xe   : > { %s704_s6 = smov [#allocation2]  }
   0xf   : > { %s177_s7 = sshll.u32 %s704_s6, 4  ;;  %p561_p11 = pneg %p789_p10  ;;  %s178_s7 = int_to_ptr.vmem [resolvable:$true] %s177_s7 }
  0x10   : > { %s623_s8 = scalar_lea.vmem %s178_s7, 4096  ;;  %p631_p3 = scmp.lt.s32.totalorder %s178_s7, %s178_s7 }
  0x11   : > { %p562_p12 = pnand %p569_p9, %p561_p11  ;;  %p624_p0 = scmp.ne.s32.totalorder %s178_s7, %s623_s8 }
  0x12   : > { %p632_p4 = scmp.lt.s32.totalorder %s623_s8, %s623_s8 }
  0x13   : > { %p614_p13 = pneg %p562_p12 }
  0x14   : > { %p633_p6 = por %p632_p4, %p631_p3 }
  0x15   : > { %p626_p1 = pnand %p624_p0, %p614_p13 }
  0x17   : > { %p627_p2 = pneg %p626_p1 }
  0x19   : > { %p634_p7 = pnand %p633_p6, %p627_p2 }
  0x1b   : > { %637 = shalt.err (!%p634_p7)
}
  0x1c   : > { %s705_s9 = smov 128   ;;  %s706_s10 = smov 8  }
  0x1d   : > { %564 = dma.hbm_to_vmem [thread:$0]  (!%p562_p12), %s856_s2, 4096, %s178_s7, [#allocation3], %s705_s9, %s705_s9, %s706_s10  }
  0x1e   : > { %213 = sbr.rel (%p789_p10) target bundleno = 691 (0x2b3), region = 40 }
  0x23   : > { %681 = dma.done.wait (%p569_p9), [#allocation3], 4096  }
  0x24   : > { %683 = vsyncadd (%p569_p9), [#allocation3], 4294963200  ;;  %p244_p8 = scmp.lt.s32.totalorder %s761_s22, 1  ;;  %v707_v0 = vmov 0   ;;  %v304_v2 = vld [vmem:[#allocation2 + $0xf8] sm:$0xff]  ;;  %v303_v4 = vld [vmem:[#allocation2 + $0xf0] sm:$0xff]  ;;  %v254_v35 = vlaneseq }
  0x25   : > { %609 = vset.pattern.permute.xlu0 %v707_v0  ;;  %520 = vmatprep.subr.mxu0 %v304_v2  ;;  %v288_v3 = vld [vmem:[#allocation2 + $0x78] sm:$0xff]  ;;  %v287_v5 = vld [vmem:[#allocation2 + $0x70] sm:$0xff]  ;;  %v302_v7 = vld [vmem:[#allocation2 + $0xe8] sm:$0xff]  ;;  %v708_v40 = vmov 1.0   ;;  %s241_s30 = sand.u32 1, %s694_s19   ;;  %s517_s11 = sshll.u32 %s761_s22, 7 }
  0x26   : > { %s245_s13 = scalar_select %p244_p8, %s761_s22, 1  ;;  %521 = vmatpush3.msra.mxu0 %v288_v3  ;;  %v286_v8 = vld [vmem:[#allocation2 + $0x68] sm:$0xff]  ;;  %v301_v9 = vld [vmem:[#allocation2 + $0xe0] sm:$0xff]  ;;  %v300_v11 = vld [vmem:[#allocation2 + $0xd8] sm:$0xff]  ;;  %v255_v36 = vand.u32 127, %v254_v35 }
  0x27   : > { %522 = vmatprep.subr.mxu0 %v303_v4  ;;  %v285_v10 = vld [vmem:[#allocation2 + $0x60] sm:$0xff]  ;;  %v284_v12 = vld [vmem:[#allocation2 + $0x58] sm:$0xff]  ;;  %v299_v13 = vld [vmem:[#allocation2 + $0xd0] sm:$0xff]  ;;  %s507_s6 = sshll.u32 %s241_s30, 3  ;;  %s416_s16 = scalar_lea.hbm %s859_s5, %s517_s11 }
  0x28   : > { %s508_s14 = sshll.u32 %s245_s13, 3  ;;  %523 = vmatpush3.msra.mxu0 %v287_v5  ;;  %v283_v14 = vld [vmem:[#allocation2 + $0x50] sm:$0xff]  ;;  %v298_v15 = vld [vmem:[#allocation2 + $0xc8] sm:$0xff]  ;;  %v297_v17 = vld [vmem:[#allocation2 + $0xc0] sm:$0xff]  ;;  %v256_v38 = vadd.s32 128, %v255_v36  ;;  %s243_s12 = scalar_lea.vmem [#allocation5], %s507_s6 }
  0x29   : > { %s247_s17 = scalar_lea.vmem %s854_s0, %s508_s14  ;;  %s251_s26 = scalar_lea.vmem %s855_s1, %s508_s14  ;;  %524 = vmatprep.subr.mxu0 %v302_v7  ;;  %v282_v16 = vld [vmem:[#allocation2 + $0x48] sm:$0xff]  ;;  %v281_v18 = vld [vmem:[#allocation2 + $0x40] sm:$0xff]  ;;  %v296_v19 = vld [vmem:[#allocation2 + $0xb8] sm:$0xff] }
  0x2a   : > { %v252_v1 = vld [vmem:[%s247_s17] sm:$0xff]  ;;  %525 = vmatpush3.msra.mxu0 %v286_v8  ;;  %v280_v20 = vld [vmem:[#allocation2 + $0x38] sm:$0xff]  ;;  %v295_v21 = vld [vmem:[#allocation2 + $0xb0] sm:$0xff]  ;;  %s418_s13 = sshll.u32 %s243_s12, 4  ;;  %s405_s17 = scalar_lea.sflag [#allocation4], %s241_s30  ;;  %s419_s13 = int_to_ptr.vmem [resolvable:$true] %s418_s13 }
  0x2b   : > { %258 = vperm.xlu0 %609, %v252_v1   ;;  %v253_v6 = vld [vmem:[%s251_s26] sm:$0xff]  ;;  %526 = vmatprep.subr.mxu0 %v301_v9  ;;  %v279_v22 = vld [vmem:[#allocation2 + $0x30] sm:$0xff]  ;;  %v294_v23 = vld [vmem:[#allocation2 + $0xa8] sm:$0xff]  ;;  %s638_s23 = scalar_lea.vmem %s419_s13, 128  ;;  %s709_s25 = smov [#allocation5]  }
  0x2c   : > { %527 = vmatpush3.msra.mxu0 %v285_v10  ;;  %v278_v24 = vld [vmem:[#allocation2 + $0x28] sm:$0xff]  ;;  %v293_v25 = vld [vmem:[#allocation2 + $0xa0] sm:$0xff]  ;;  %v292_v27 = vld [vmem:[#allocation2 + $0x98] sm:$0xff]  ;;  %p639_p6 = scmp.ne.s32.totalorder %s419_s13, %s638_s23  ;;  %s642_s26 = sshll.u32 %s709_s25, 4  ;;  %s643_s26 = int_to_ptr.vmem [resolvable:$false] %s642_s26 }
  0x2d   : > { %528 = vmatprep.subr.mxu0 %v300_v11  ;;  %v277_v26 = vld [vmem:[#allocation2 + $0x20] sm:$0xff]  ;;  %v276_v28 = vld [vmem:[#allocation2 + $0x18] sm:$0xff]  ;;  %v291_v29 = vld [vmem:[#allocation2 + $0x90] sm:$0xff]  ;;  %s644_s22 = scalar_lea.vmem %s643_s26, 256  ;;  %p645_p11 = scmp.lt.s32.totalorder %s419_s13, %s643_s26 }
  0x2e   : > { %529 = vmatpush3.msra.mxu0 %v284_v12  ;;  %v275_v30 = vld [vmem:[#allocation2 + $0x10] sm:$0xff]  ;;  %v290_v31 = vld [vmem:[#allocation2 + $0x88] sm:$0xff]  ;;  %v289_v33 = vld [vmem:[#allocation2 + $0x80] sm:$0xff]  ;;  %p640_p9 = pnand %p639_p6, %p778_p5  ;;  %p646_p12 = scmp.lt.s32.totalorder %s644_s22, %s638_s23 }
  0x2f   : > { %263 = vperm.xlu0 %609, %v253_v6   ;;  %530 = vmatprep.subr.mxu0 %v299_v13  ;;  %v274_v32 = vld [vmem:[#allocation2 + $0x8] sm:$0xff]  ;;  %v273_v34 = vld [vmem:[#allocation2] sm:$0xff] }
  0x30   : > { %531 = vmatpush3.msra.mxu0 %v283_v14  ;;  %v514_v52 = vld [vmem:[%s857_s3] ss:$0 sm:$0xff]  ;;  %p641_p10 = pneg %p640_p9  ;;  %p647_p13 = por %p646_p12, %p645_p11 }
  0x31   : > { %532 = vmatprep.subr.mxu0 %v298_v15  ;;  %v515_v54 = vld [vmem:[%s858_s4] ss:$0 sm:$0xff] }
  0x32   : > { %533 = vmatpush3.msra.mxu0 %v282_v16  ;;  %p648_p0 = pnand %p647_p13, %p641_p10 }
  0x33   : > { %534 = vmatprep.subr.mxu0 %v297_v17 }
  0x34   : > { %535 = vmatpush3.msra.mxu0 %v281_v18 }
  0x35   : > { %536 = vmatprep.subr.mxu0 %v296_v19 }
  0x36   : > { %537 = vmatpush3.msra.mxu0 %v280_v20 }
  0x37   : > { %538 = vmatprep.subr.mxu0 %v295_v21 }
  0x38   : > { %539 = vmatpush3.msra.mxu0 %v279_v22 }
  0x39   : > { %540 = vmatprep.subr.mxu0 %v294_v23 }
  0x3a   : > { %541 = vmatpush3.msra.mxu0 %v278_v24 }
  0x3b   : > { %542 = vmatprep.subr.mxu0 %v293_v25 }
  0x3c   : > { %543 = vmatpush3.msra.mxu0 %v277_v26 }
  0x3d   : > { %544 = vmatprep.subr.mxu0 %v292_v27 }
  0x3e   : > { %545 = vmatpush3.msra.mxu0 %v276_v28 }
  0x3f   : > { %546 = vmatprep.subr.mxu0 %v291_v29 }
  0x40   : > { %547 = vmatpush3.msra.mxu0 %v275_v30 }
  0x41   : > { %548 = vmatprep.subr.mxu0 %v290_v31 }
  0x42   : > { %549 = vmatpush3.msra.mxu0 %v274_v32 }
  0x43   : > { %550 = vmatprep.subr.mxu0 %v289_v33 }
  0x44   : > { %551 = vmatpush3.msra.mxu0 %v273_v34 }
  0xa6   : > { %v259_v37 = vpop.permute.xlu0 %258 }
  0xa7   : > { %vm260_vm0 = vcmp.eq.s32.totalorder %v259_v37, %v255_v36  ;;  %vm261_vm4 = vcmp.eq.s32.totalorder %v259_v37, %v256_v38 }
  0xaa   : > { %v264_v39 = vpop.permute.xlu0 %263 }
  0xab   : > { %vm265_vm1 = vcmp.eq.s32.totalorder %v264_v39, %v255_v36  ;;  %vm266_vm2 = vcmp.eq.s32.totalorder %v264_v39, %v256_v38 }
  0xac   : > { %vm267_vm3 = vmor %vm260_vm0, %vm265_vm1 }
  0xad   : > { %vm268_vm5 = vmor %vm261_vm4, %vm266_vm2 }
  0xae   : > { %512 = vmatprep.mubr.msk.f32.mxu0 %vm268_vm5, %v708_v40 }
  0xaf   : > { %513 = vmatmul.mubr.msk.f32.vlgmr.msra.gmra.mxu0 %vm267_vm3, %v708_v40 }
 0x16f   : > { %v552_v41 = vpop.f32.mrf.mxu0 }
 0x171   : > { %v553_v42 = vpop.f32.mrf.mxu0 }
 0x172   : > { %v554_v43 = vadd.f32 %v553_v42, %v552_v41 }
 0x174   : > { %375 = vadd.xlane.f32.xlu1 %v554_v43 }
 0x1fd   : > { %v376_v44 = vpop.xlane.xlu1 %375 }
 0x1fe   : > { %v378_v45 = vmul.f32 0.0078125, %v376_v44 }
 0x200   : > { %v379_v46 = vsub.f32 %v554_v43, %v378_v45 }
 0x202   : > { %v380_v47 = vmul.f32 %v379_v46, %v379_v46 }
 0x204   : > { %381 = vadd.xlane.f32.xlu1 %v380_v47 }
 0x28d   : > { %v382_v48 = vpop.xlane.xlu1 %381 }
 0x28e   : > { %v383_v49 = vmul.f32 0.0078125, %v382_v48 }
 0x290   : > { %v384_v50 = vadd.f32 1e-05, %v383_v49 }
 0x292   : > { %610 = vrsqrt.f32 %v384_v50 }
 0x29f   : > { %v611_v51 = vpop.eup %610 }
 0x2a0   : > { %v386_v53 = vmul.f32 %v611_v51, %v379_v46 }
 0x2a2   : > { %v394_v55 = vmul.f32 %v514_v52, %v386_v53 }
 0x2a4   : > { %v402_v56 = vadd.f32 %v515_v54, %v394_v55 }
 0x2a6   : > { %403 = vst [vmem:[%s243_s12] sm:$0xff] %v402_v56 }
 0x2a7   : > { %651 = shalt.err (!%p648_p0)
}
 0x2a8   : > { %s652_s6 = scalar_lea.hbm %s416_s16, 128  ;;  %s656_s8 = scalar_lea.hbm %s859_s5, 256 }
 0x2a9   : > { %p653_p1 = scmp.ne.s32.totalorder %s416_s16, %s652_s6  ;;  %p657_p4 = scmp.lt.s32.totalorder %s416_s16, %s859_s5 }
 0x2aa   : > { %p658_p7 = scmp.lt.s32.totalorder %s656_s8, %s652_s6 }
 0x2ab   : > { %p654_p2 = pnand %p653_p1, %p778_p5 }
 0x2ac   : > { %p659_p8 = por %p658_p7, %p657_p4 }
 0x2ad   : > { %p655_p3 = pneg %p654_p2 }
 0x2af   : > { %p660_p6 = pnand %p659_p8, %p655_p3 }
 0x2b1   : > { %663 = shalt.err (!%p660_p6)
}
 0x2b2   : > { %559 = dma.vmem_to_hbm [thread:$0]  (%p778_p5), %s419_s13, 128, %s416_s16, %s405_s17  }
 0x2b3 PF: > { %p571_p9 = scmp.ge.s32.totalorder %s702_s21, 2  ;;  %s430_s11 = sand.u32 1, %s690_s18  }
 0x2b4   : > { %p863_p10 = scmp.ne.s32.totalorder %s861_s29, 0  ;;  %s431_s12 = scalar_lea.sflag [#allocation4], %s430_s11 }
 0x2b6   : > { %p566_p11 = pnand %p571_p9, %p863_p10 }
 0x2b8   : > { %p567_p12 = pneg %p566_p11 }
 0x2ba   : > { %685 = dma.done.wait (%p567_p12), %s431_s12, 128  }
 0x2bb   : > { %687 = vsyncadd (%p567_p12), %s431_s12, 4294967168  ;;  %p16_p13 = scmp.ge.s32.totalorder %s765_s24, 4   ;;  %s864_s18 = smov %s694_s19 }
 0x2bc   : > { %s865_s19 = smov %s698_s20  ;;  %s866_s20 = smov %s776_s27 }
 0x2bd   : > { %s867_s21 = smov %s765_s24  ;;  %18 = sbr.rel (!%p16_p13) target bundleno = 4 (0x4), region = 83 }
 0x2c2   :  { %436 = vsyncpa [#allocation3], 1 }
 0x2c3   :  { %438 = vsyncpa [#allocation3 + $0x1], 1 }
 0x2c4   :  { %439 = vsyncpa [#allocation4], 1 }
 0x2c5   :  { %441 = vsyncpa [#allocation4 + $0x1], 1 }

</bundles_post_ra>
